<compile_context>
chip_gen: v7x
topology: tpu7x:2x2x1
jax: 0.10.0
libtpu: 0.0.40
codegen_flags: <defaults>
</compile_context>

<pallas_src>
import jax
import jax.numpy as jnp
from jax.experimental import pallas as pl
from jax.experimental.pallas import tpu as pltpu


def _ce_rows_kernel(x_ref, ce_ref):
    # x_ref: (TB, TR, N) logits block (native dtype). ce_ref: (TB, 1, TR) f32.
    x = x_ref[...].astype(jnp.float32)                    # cast in-kernel
    tb, tr, n = x.shape

    # Numerically stable shifted logits; the shift cancels in (lse - picked).
    t = x - jnp.max(x, axis=-1, keepdims=True)            # (TB, TR, N)
    lse = jnp.log(jnp.sum(jnp.exp(t), axis=-1))           # (TB, TR)

    # target = arange(N): row j of this row-block picks column (r0 + j).
    r0 = pl.program_id(1) * tr
    row = jax.lax.broadcasted_iota(jnp.int32, (tr, n), 0)
    col = jax.lax.broadcasted_iota(jnp.int32, (tr, n), 1)
    picked = jnp.sum(jnp.where((col == row + r0)[None, :, :], t, 0.0), axis=-1)

    ce_ref[...] = (lse - picked)[:, None, :]               # (TB, 1, TR)


def _pick_tiles(batch, n, in_itemsize, budget_bytes=28 << 20):
    """Pick (TB, TR): batch-block and row-block sizes.

    The budget counts the double-buffered input tile plus ~3 f32 elementwise
    temporaries that the body materializes in VMEM (cast copy, shifted
    logits, exp / masked slab), so enlarging tiles cannot silently spill.
    """
    per_elem = 2 * in_itemsize + 3 * 4
    max_elems = max(1, budget_bytes // per_elem)

    if n * n <= max_elems:
        # Whole (N, N) slab(s) fit: tile over the batch axis only.
        tr = n
        tb = max(1, min(batch, max_elems // (n * n)))
    else:
        # Large N: tile rows. TR is a multiple of 128 so both the input
        # sublane tiling (any dtype) and the output lane tiling stay legal.
        tb = 1
        tr = max(128, (max_elems // n) // 128 * 128)
        tr = min(tr, n)

    # Guarantee >= 2 grid steps so the v7x megacore can split the batch axis.
    if batch >= 2:
        tb = min(tb, -(-batch // 2))
    return tb, tr


def triplet_loss_tpu(outputs):
    """outputs: (bs, n_vertices, n_vertices) logits (any float dtype)."""
    x = outputs
    B, N, N2 = x.shape
    assert N == N2, "expected square (bs, n, n) scores"

    TB, TR = _pick_tiles(B, N, jnp.dtype(x.dtype).itemsize)
    grid = (pl.cdiv(B, TB), pl.cdiv(N, TR))   # ragged blocks are padded by Pallas

    ce = pl.pallas_call(
        _ce_rows_kernel,
        out_shape=jax.ShapeDtypeStruct((B, 1, N), jnp.float32),
        grid_spec=pltpu.PrefetchScalarGridSpec(
            num_scalar_prefetch=0,
            grid=grid,
            in_specs=[pl.BlockSpec((TB, TR, N), lambda b, r: (b, r, 0))],
            out_specs=pl.BlockSpec((TB, 1, TR), lambda b, r: (b, 0, r)),
        ),
        compiler_params=pltpu.CompilerParams(
            dimension_semantics=("parallel", "parallel"),
            vmem_limit_bytes=48 * 1024 * 1024,
        ),
    )(x)

    # loss_reduction='mean': sum of per-row CE divided by (B * N).
    return jnp.mean(ce)


if __name__ == "__main__":
    key = jax.random.PRNGKey(0)
    B, N = 2, 8                               # (bs, n_vertices, n_vertices)
    outputs = jax.random.normal(key, (B, N, N), dtype=jnp.float32)

    loss = triplet_loss_tpu(outputs)
    jax.block_until_ready(loss)

    # Pure-JAX reference of the torch module forward.
    ref = jnp.mean(
        jax.nn.logsumexp(outputs, axis=-1)
        - jnp.diagonal(outputs, axis1=-2, axis2=-1)
    )
    assert jnp.abs(loss - ref) < 1e-4, (loss, ref)

    # bf16 path: input streams at half the HBM bytes, cast to f32 in-kernel.
    out_bf16 = outputs.astype(jnp.bfloat16)
    loss_bf16 = triplet_loss_tpu(out_bf16)
    jax.block_until_ready(loss_bf16)
    xf = out_bf16.astype(jnp.float32)
    ref_bf16 = jnp.mean(
        jax.nn.logsumexp(xf, axis=-1) - jnp.diagonal(xf, axis1=-2, axis2=-1)
    )
    assert jnp.abs(loss_bf16 - ref_bf16) < 1e-3, (loss_bf16, ref_bf16)

    print("KERNEL_OK")
</pallas_src>

<mosaic_0001>
module attributes {stable_mosaic.version = 11 : i64} {
  func.func @_ce_rows_kernel(%arg0: i32, %arg1: i32, %arg2: memref<1x8x8xf32, #tpu.memory_space<vmem>>, %arg3: memref<1x1x8xf32, #tpu.memory_space<vmem>>) attributes {dimension_semantics = [#tpu.dimension_semantics<parallel>, #tpu.dimension_semantics<parallel>], iteration_bounds = array<i64: 2, 1>, scalar_prefetch = 0 : i64, scratch_operands = 0 : i64, tpu.core_type = #tpu.core_type<tc>, window_params = [{transform_indices = @transform_0, window_bounds = array<i64: 1, 8, 8>}, {transform_indices = @transform_1, window_bounds = array<i64: 1, 1, 8>}]} {
    %c0 = arith.constant 0 : index
    %c0_0 = arith.constant 0 : index
    %c0_1 = arith.constant 0 : index
    %0 = vector.load %arg2[%c0, %c0_0, %c0_1] : memref<1x8x8xf32, #tpu.memory_space<vmem>>, vector<1x8x8xf32>
    %cst = arith.constant dense<0xFF800000> : vector<1x8xf32>
    %1 = vector.multi_reduction <maximumf>, %0, %cst [2] : vector<1x8x8xf32> to vector<1x8xf32>
    %2 = vector.shape_cast %1 : vector<1x8xf32> to vector<1x8x1xf32>
    %3 = vector.broadcast %2 : vector<1x8x1xf32> to vector<1x8x8xf32>
    %4 = arith.subf %0, %3 : vector<1x8x8xf32>
    %5 = math.exp %4 : vector<1x8x8xf32>
    %cst_2 = arith.constant dense<0.000000e+00> : vector<1x8xf32>
    %6 = vector.multi_reduction <add>, %5, %cst_2 [2] : vector<1x8x8xf32> to vector<1x8xf32>
    %7 = math.log %6 : vector<1x8xf32>
    %c8_i32 = arith.constant 8 : i32
    %8 = arith.muli %arg1, %c8_i32 : i32
    %9 = tpu.iota {dimensions = array<i32: 0>} : vector<8x8xi32>
    %10 = tpu.iota {dimensions = array<i32: 1>} : vector<8x8xi32>
    %11 = vector.broadcast %8 : i32 to vector<8x8xi32>
    %12 = arith.addi %9, %11 : vector<8x8xi32>
    %13 = arith.cmpi eq, %10, %12 : vector<8x8xi32>
    %14 = vector.shape_cast %13 : vector<8x8xi1> to vector<1x8x8xi1>
    %cst_3 = arith.constant 0.000000e+00 : f32
    %15 = vector.broadcast %cst_3 : f32 to vector<1x8x8xf32>
    %16 = arith.select %14, %4, %15 : vector<1x8x8xi1>, vector<1x8x8xf32>
    %cst_4 = arith.constant dense<0.000000e+00> : vector<1x8xf32>
    %17 = vector.multi_reduction <add>, %16, %cst_4 [2] : vector<1x8x8xf32> to vector<1x8xf32>
    %18 = arith.subf %7, %17 : vector<1x8xf32>
    %19 = vector.shape_cast %18 : vector<1x8xf32> to vector<1x1x8xf32>
    %c0_5 = arith.constant 0 : index
    %c0_6 = arith.constant 0 : index
    %c0_7 = arith.constant 0 : index
    %20 = vector.load %arg3[%c0_5, %c0_6, %c0_7] : memref<1x1x8xf32, #tpu.memory_space<vmem>>, vector<1x1x8xf32>
    tpu.vector_store %arg3[%c0_5, %c0_6, %c0_7], %19 {strides = array<i32>} : memref<1x1x8xf32, #tpu.memory_space<vmem>>, vector<1x1x8xf32>,
    return
  }
  func.func @transform_0(%arg0: i32, %arg1: i32) -> (i32, i32, i32) {
    %c0_i32 = arith.constant 0 : i32
    %c0_i32_0 = arith.constant 0 : i32
    return %arg0, %arg1, %c0_i32 : i32, i32, i32
  }
  func.func @transform_1(%arg0: i32, %arg1: i32) -> (i32, i32, i32) {
    %c0_i32 = arith.constant 0 : i32
    %c0_i32_0 = arith.constant 0 : i32
    return %arg0, %c0_i32, %arg1 : i32, i32, i32
  }
}

</mosaic_0001>

<bundles_post_ra>
// kernel: tpu_custom_call.1
= control target key start
LH: loop header
LB: loop body
LE: loop exit
PB: predicated region body
PF: predicated region fallthrough
CT: control target
= control target key end

     0   :  { %6 = vsyncpa [#allocation3], 0  ;;  %s651_s0 = inlined_call_operand.hbm [shape: f32[2,8,8], index: 0, kind: input, shape index: {}]   ;;  %s652_s1 = inlined_call_operand.hbm [shape: f32[2,1,8], index: 1, kind: output, shape index: {}]  }
   0x1   :  { %8 = vsyncpa [#allocation3 + $0x1], 0 }
   0x2   :  { %9 = vsyncpa [#allocation4], 0 }
   0x3   :  { %11 = vsyncpa [#allocation4 + $0x1], 0  ;;  %s475_s6 = smov 0   ;;  %s477_s7 = smov 0  }
   0x4   :  { %s479_s8 = smov 0   ;;  %s481_s9 = smov 0  }
   0x5   :  { %s483_s10 = smov 0   ;;  %s485_s11 = smov 0  }
   0x6 LB: > { %s272_s12 = sadd.s32 4294967295, %s461_s11   ;;  %s273_s13 = sadd.s32 4294967294, %s461_s11   ;;  %s461_s11 = sphi %s485_s11, %s17_s11   ;;  %s457_s10 = sphi %s483_s10, %s668_s10   ;;  %s453_s9 = sphi %s481_s9, %s667_s9   ;;  %s449_s8 = sphi %s479_s8, %s666_s8   ;;  %s445_s7 = sphi %s477_s7, %s665_s7   ;;  %s441_s6 = sphi %s475_s6, %s664_s6  }
   0x7   : > { %s29_s14 = sadd.s32 1, %s457_s10  ;;  %s38_s15 = sadd.s32 1, %s449_s8 }
   0x8   : > { %p31_p0 = scmp.ge.s32.totalorder %s29_s14, 2  ;;  %p45_p1 = scmp.ne.s32.totalorder %s449_s8, %s445_s7 }
   0x9   : > { %p46_p2 = scmp.eq.s32.totalorder %s461_s11, 0  ;;  %p51_p3 = scmp.ne.s32.totalorder %s445_s7, %s441_s6 }
   0xa   : > { %s670_s14 = smov (%p31_p0, %s29_s14), 0  ;;  %p52_p5 = scmp.eq.s32.totalorder %s272_s12, 0 }
   0xb   : > { %p516_p4 = por %p46_p2, %p45_p1  ;;  %s33_s17 = ssub.s32 %s457_s10, %s670_s14 }
   0xc   : > { %p77_p6 = scmp.eq.s32.totalorder %s272_s12, 1  ;;  %p36_p7 = scmp.eq.s32.totalorder %s33_s17, 0 }
   0xd   : > { %p522_p8 = por %p52_p5, %p51_p3  ;;  %p83_p10 = scmp.eq.s32.totalorder %s273_s13, 1 }
   0xe   : > { %p526_p9 = por %p77_p6, %p45_p1  ;;  %p295_p13 = scmp.lt.s32.totalorder %s461_s11, 2 }
   0xf   : > { %s531_s20 = scalar_select %p36_p7, %s449_s8, %s38_s15  }
  0x10   : > { %s656_s19 = scalar_select %p526_p9, 1, 0 }
  0x11   : > { %p533_p11 = por %p83_p10, %p51_p3  ;;  %s103_s22 = sand.u32 1, %s449_s8  }
  0x12   : > { %s276_s23 = sshll.u32 %s103_s22, 3  ;;  %s277_s24 = sshll.u32 %s457_s10, 7 }
  0x13   : > { %s657_s21 = scalar_select %p533_p11, 1, 0 }
  0x14   : > { %s544_s27 = scalar_lea.hbm %s651_s0, %s277_s24  ;;  %s107_s28 = scalar_lea.vmem [#allocation2], %s276_s23 }
  0x15   : > { %s115_s29 = sshll.u32 %s107_s28, 4  ;;  %p550_p0 = pnand %p295_p13, %p516_p4  ;;  %s546_s29 = int_to_ptr.vmem [resolvable:$true] %s115_s29 }
  0x16   : > { %s104_s2 = scalar_lea.sflag [#allocation3], %s103_s22  ;;  %s349_s3 = scalar_lea.hbm %s544_s27, 128 }
  0x17   : > { %p350_p3 = scmp.ne.s32.totalorder %s544_s27, %s349_s3  ;;  %p351_p5 = pneg %p550_p0 }
  0x18   : > { %s354_s12 = scalar_lea.hbm %s651_s0, 256  ;;  %p355_p4 = scmp.lt.u32.totalorder %s544_s27, %s651_s0 }
  0x19   : > { %p352_p6 = pnand %p351_p5, %p350_p3  ;;  %p356_p10 = scmp.lt.u32.totalorder %s354_s12, %s349_s3 }
  0x1a   : > { %p358_p12 = scmp.lt.u32.totalorder %s349_s3, %s544_s27 }
  0x1b   : > { %p353_p7 = pneg %p352_p6  ;;  %p357_p13 = por %p356_p10, %p355_p4 }
  0x1d   : > { %p359_p1 = por %p358_p12, %p357_p13 }
  0x1f   : > { %p360_p2 = pnand %p359_p1, %p353_p7 }
  0x21   : > { %363 = shalt.err (!%p360_p2)
}
  0x22   : > { %s364_s16 = scalar_lea.vmem %s546_s29, 128  ;;  %s463_s17 = smov [#allocation2]  }
  0x23   : > { %p365_p3 = scmp.ne.s32.totalorder %s546_s29, %s364_s16  ;;  %s369_s22 = sshll.u32 %s463_s17, 4  ;;  %s370_s22 = int_to_ptr.vmem [resolvable:$false] %s369_s22 }
  0x24   : > { %s371_s23 = scalar_lea.vmem %s370_s22, 256  ;;  %p372_p9 = scmp.lt.s32.totalorder %s546_s29, %s370_s22 }
  0x25   : > { %p367_p6 = pnand %p365_p3, %p351_p5  ;;  %p373_p4 = scmp.lt.s32.totalorder %s371_s23, %s364_s16 }
  0x27   : > { %p368_p11 = pneg %p367_p6  ;;  %p374_p10 = por %p373_p4, %p372_p9 }
  0x29   : > { %p375_p12 = pnand %p374_p10, %p368_p11 }
  0x2b   : > { %378 = shalt.err (!%p375_p12)
}
  0x2c   : > { %290 = dma.hbm_to_vmem [thread:$0]  (!%p550_p0), %s544_s27, 128, %s546_s29, %s104_s2  }
  0x2d   : > { %p659_p1 = scmp.lt.s32.totalorder %s461_s11, 3  ;;  %p660_p2 = scmp.ge.s32.totalorder %s461_s11, 1 }
  0x2f   : > { %p121_p5 = pnand %p660_p2, %p659_p1 }
  0x30   : > { %s586_s24 = sand.u32 (!%p121_p5), 1, %s445_s7  }
  0x31   : > { %124 = sbr.rel (%p121_p5) target bundleno = 390 (0x186), region = 24  ;;  %s279_s25 = sshll.u32 (!%p121_p5), %s586_s24, 3 }
  0x32   : > { %s127_s26 = scalar_lea.sflag (!%p121_p5), [#allocation3], %s586_s24  ;;  %s130_s28 = scalar_lea.vmem (!%p121_p5), [#allocation2], %s279_s25 }
  0x38   : > { %432 = dma.done.wait (%p522_p8), %s127_s26, 128  }
  0x39   : > { %434 = vsyncadd (%p522_p8), %s127_s26, 4294967168  ;;  %vm149_vm0 = vcmask 64512   ;;  %v148_v0 = vld [vmem:[%s130_s28] sm:$0xff]  ;;  %v162_v2 = vlaneseq  ;;  %s280_s18 = sshll.u32 %s453_s9, 4  ;;  %s147_s27 = scalar_lea.vmem [#allocation5], %s586_s24  ;;  %vm180_vm2 = vcmask 57344  }
  0x3a   : > { %v150_v1 = vsel %vm149_vm0, %v148_v0, -inf  ;;  %s196_s29 = sshll.u32 %s147_s27, 4  ;;  %s602_s3 = scalar_lea.hbm %s652_s1, %s280_s18  ;;  %s604_s29 = int_to_ptr.vmem [resolvable:$true] %s196_s29 }
  0x3b   : > { %151 = vmax.xlane.f32.xlu0 %v150_v1  ;;  %v163_v3 = vshrl.u32 %v162_v2, 7  ;;  %v165_v4 = vand.u32 127, %v162_v2  ;;  %s183_s4 = scalar_lea.sflag [#allocation4], %s586_s24  ;;  %s379_s5 = scalar_lea.vmem %s604_s29, 16 }
  0x3c   : > { %p380_p8 = scmp.ne.s32.totalorder %s604_s29, %s379_s5  ;;  %p661_p9 = scmp.ne.s32.totalorder %s656_s19, 0 }
  0x3d   : > { %v177_v5 = vsub.s32 %v165_v4, %v163_v3  ;;  %vm168_vm1 = vcmp.eq.s32.totalorder %v165_v4, %v163_v3  ;;  %s464_s9 = smov [#allocation5]  }
  0x3e   : > { %p381_p11 = pnand %p380_p8, %p661_p9  ;;  %s383_s12 = sshll.u32 %s464_s9, 4  ;;  %s384_s12 = int_to_ptr.vmem [resolvable:$false] %s383_s12 }
  0x3f   : > { %s385_s13 = scalar_lea.vmem %s384_s12, 32  ;;  %p386_p7 = scmp.lt.s32.totalorder %s604_s29, %s384_s12 }
  0x40   : > { %p382_p0 = pneg %p381_p11  ;;  %p387_p13 = scmp.lt.s32.totalorder %s385_s13, %s379_s5 }
  0x42   : > { %p388_p3 = por %p387_p13, %p386_p7 }
  0x44   : > { %p389_p6 = pnand %p388_p3, %p382_p0 }
  0xc8   : > { %v152_v6 = vpop.xlane.xlu0 %151 }
  0xc9   : > { %v153_v7 = vsub.f32 %v148_v0, %v152_v6 }
  0xcb   : > { %v154_v8 = vmul.f32 1.442695, %v153_v7  ;;  %v169_v9 = vsel %vm168_vm1, %v153_v7, 0.0 }
  0xcc   : > { %v170_v10 = vsel %vm149_vm0, %v169_v9, 0.0 }
  0xcd   : > { %345 = vpow2.f32 %v154_v8  ;;  %171 = vadd.xlane.f32.xlu1 %v170_v10 }
  0xd7   : > { %v346_v11 = vpop.eup %345 }
  0xd8   : > { %v156_v12 = vsel %vm149_vm0, %v346_v11, 0.0 }
  0xd9   : > { %157 = vadd.xlane.f32.xlu0 %v156_v12 }
 0x15a   : > { %v172_v16 = vpop.xlane.xlu1 %171 }
 0x166   : > { %v158_v13 = vpop.xlane.xlu0 %157 }
 0x167   : > { %347 = vlog2.f32 %v158_v13 }
 0x171   : > { %v348_v14 = vpop.eup %347 }
 0x172   : > { %v160_v15 = vmul.f32 0.6931472, %v348_v14 }
 0x174   : > { %v173_v17 = vsub.f32 %v160_v15, %v172_v16 }
 0x176   : > { %v178_v18 = vrot.slane %v173_v17, %v177_v5 }
 0x178   : > { %181 = vst.msk [vmem:[%s147_s27] sm:$0x1] %vm180_vm2, %v178_v18 }
 0x179   : > { %392 = shalt.err (!%p389_p6)
}
 0x17a   : > { %s393_s15 = scalar_lea.hbm %s602_s3, 16  ;;  %s397_s22 = scalar_lea.hbm %s652_s1, 32 }
 0x17b   : > { %p394_p4 = scmp.ne.s32.totalorder %s602_s3, %s393_s15  ;;  %p398_p1 = scmp.lt.u32.totalorder %s602_s3, %s652_s1 }
 0x17c   : > { %p399_p2 = scmp.lt.u32.totalorder %s397_s22, %s393_s15  ;;  %p401_p8 = scmp.lt.u32.totalorder %s393_s15, %s602_s3 }
 0x17d   : > { %p395_p10 = pnand %p394_p4, %p661_p9 }
 0x17e   : > { %p400_p5 = por %p399_p2, %p398_p1 }
 0x17f   : > { %p396_p12 = pneg %p395_p10 }
 0x180   : > { %p402_p11 = por %p401_p8, %p400_p5 }
 0x182   : > { %p403_p0 = pnand %p402_p11, %p396_p12 }
 0x184   : > { %406 = shalt.err (!%p403_p0)
}
 0x185   : > { %285 = dma.vmem_to_hbm [thread:$0]  (%p661_p9), %s604_s29, 16, %s602_s3, %s183_s4  }
 0x186 PF: > { %s208_s25 = sand.u32 1, %s441_s6   ;;  %p662_p7 = scmp.ne.s32.totalorder %s657_s21, 0 }
 0x187   : > { %p663_p13 = scmp.ge.s32.totalorder %s461_s11, 2  ;;  %s209_s26 = scalar_lea.sflag [#allocation4], %s208_s25 }
 0x189   : > { %p292_p3 = pnand %p663_p13, %p662_p7 }
 0x18b   : > { %436 = dma.done.wait (!%p292_p3), %s209_s26, 16  }
 0x18c   : > { %438 = vsyncadd (!%p292_p3), %s209_s26, 4294967280  ;;  %s17_s11 = sadd.s32 1, %s461_s11   ;;  %s664_s6 = smov %s445_s7 }
 0x18d   : > { %p14_p6 = scmp.ge.s32.totalorder %s17_s11, 4   ;;  %s665_s7 = smov %s449_s8 }
 0x18e   : > { %s666_s8 = smov %s531_s20  ;;  %s667_s9 = smov %s457_s10 }
 0x18f   : > { %s668_s10 = smov %s670_s14  ;;  %16 = sbr.rel (!%p14_p6) target bundleno = 6 (0x6), region = 69 }
 0x196   :  { %213 = vsyncpa [#allocation3], 1 }
 0x197   :  { %215 = vsyncpa [#allocation3 + $0x1], 1 }
 0x198   :  { %216 = vsyncpa [#allocation4], 1 }
 0x199   :  { %218 = vsyncpa [#allocation4 + $0x1], 1 }

</bundles_post_ra>
